<compile_context>
chip_gen: v7x
topology: tpu7x:2x2x1
jax: 0.10.0
libtpu: 0.0.40
codegen_flags: <defaults>
</compile_context>

<pallas_src>
import functools

import jax
import jax.numpy as jnp
from jax.experimental import pallas as pl
from jax.experimental.pallas import tpu as pltpu


def _round_up(x, m):
    return (x + m - 1) // m * m


def _chip_config():
    """Per-generation tile / VMEM defaults, keyed off the attached device kind."""
    kind = ""
    try:
        kind = jax.devices()[0].device_kind.lower()
    except Exception:
        pass
    if "v7" in kind:
        # 2 TCs/chip, 64 MiB VMEM per TC, 3.2 TB/s HBM -> roofline knee ~310 FLOP/B.
        return dict(vmem_cap=64 << 20, cores=2, tile_rows=512, bf16_vpu=True)
    if "v6" in kind:
        # 1 TC, 128 MiB VMEM, ~1.4 TB/s HBM -> knee ~700 FLOP/B: needs big row tiles.
        return dict(vmem_cap=128 << 20, cores=1, tile_rows=1024, bf16_vpu=True)
    if "v5" in kind:
        # v5e: 1 TC, 128 MiB VMEM, knee ~240 FLOP/B, no bf16 VPU.
        return dict(vmem_cap=128 << 20, cores=1, tile_rows=512, bf16_vpu=False)
    # Unknown / future chip: conservative (fits a 64 MiB VMEM).
    return dict(vmem_cap=64 << 20, cores=1, tile_rows=512, bf16_vpu=True)


def _vmem_estimate(tm, tf, D, act_bytes, cdt_bytes):
    """Rough per-step VMEM footprint (double-buffered I/O + scratch + h temp)."""
    x_io = 2 * (tm * D * act_bytes) * 2      # x in + out blocks, double-buffered
    w = 2 * 2 * (D * tf) * cdt_bytes         # wi^T + wo^T slabs, double-buffered
    scratch = tm * D * (cdt_bytes + 4)       # normed rows + fp32 accumulator
    h = tm * tf * 4                          # h intermediate (fp32-conservative)
    return x_io + w + scratch + h


def _udop_ff_kernel(x_ref, wi_t_ref, wo_t_ref, o_ref, normed_ref, acc_ref, *,
                    eps, h_dtype):
    # One (row-tile, ff-tile) grid step.
    #   x_ref:      (TM, D)  residual / layer-norm input rows   (input dtype)
    #   wi_t_ref:   (D, TF)  wi^T slab, ln weight pre-folded    (compute dtype)
    #   wo_t_ref:   (TF, D)  wo^T slab                          (compute dtype)
    #   o_ref:      (TM, D)  output rows
    #   normed_ref: (TM, D)  scratch: normalized rows, written once at f == 0
    #   acc_ref:    (TM, D)  scratch: fp32 accumulator over the d_ff axis
    f = pl.program_id(1)

    @pl.when(f == 0)
    def _():
        # UdopLayerNorm: no mean subtraction; variance = mean(x^2) in fp32.
        xf = x_ref[...].astype(jnp.float32)
        var = jnp.mean(xf * xf, axis=-1, keepdims=True)
        normed_ref[...] = (xf * jax.lax.rsqrt(var + eps)).astype(normed_ref.dtype)
        acc_ref[...] = jnp.zeros_like(acc_ref)

    # relu(normed @ wi^T_chunk) @ wo^T_chunk; fp32 MXU accumulation into acc_ref.
    # h is kept in bf16 on bf16-VPU chips (halves VPU + VMEM traffic for the relu).
    h = jnp.dot(normed_ref[...], wi_t_ref[...], preferred_element_type=h_dtype)
    h = jnp.maximum(h, 0.0)  # dense_act_fn = "relu"
    acc_ref[...] += jnp.dot(h.astype(wo_t_ref.dtype), wo_t_ref[...],
                            preferred_element_type=jnp.float32)

    @pl.when(f == pl.num_programs(1) - 1)
    def _():
        # Residual add (dropout = identity). Re-read x_ref here instead of holding
        # it live across the GEMMs (lower vreg / spill pressure).
        o_ref[...] = (x_ref[...].astype(jnp.float32) + acc_ref[...]).astype(o_ref.dtype)


def prepare_udop_ff_weights(ln_weight, wi, wo, *, compute_dtype=jnp.bfloat16,
                            tile_ff=1024):
    """One-time (parameter-load-time) weight transform.

    Folds the UdopLayerNorm weight into wi, transposes both weights into row-major GEMM
    layout, casts to the MXU compute dtype and pads d_ff up to the tile size. Hoisted out
    of the forward path so these HBM-bound passes don't run on every call.
    Returns (wi_t (D, F_pad), wo_t (F_pad, D), tf).
    """
    F, D = wi.shape
    wi_t = (wi.astype(jnp.float32) * ln_weight.astype(jnp.float32)[None, :]).T  # (D, F)
    wi_t = wi_t.astype(compute_dtype)
    wo_t = wo.T.astype(compute_dtype)                                           # (F, D)
    if F <= tile_ff:
        tf = F
    else:
        tf = _round_up(min(tile_ff, F), 256)   # multiple of 256: friendly to 2x256 / 4x128 MXUs
        f_pad = _round_up(F, tf)
        if f_pad != F:
            wi_t = jnp.pad(wi_t, ((0, 0), (0, f_pad - F)))
            wo_t = jnp.pad(wo_t, ((0, f_pad - F), (0, 0)))
    return wi_t, wo_t, tf


def udop_layer_ff_apply(hidden_states, wi_t, wo_t, *, tf, eps=1e-6,
                        tile_rows=None, weight_buffering=2):
    """Hot-path forward. hidden_states: (B, S, D); wi_t/wo_t from prepare_udop_ff_weights."""
    B, S, D = hidden_states.shape
    f_pad = wi_t.shape[1]
    M = B * S
    cfg = _chip_config()

    compute_dtype = wi_t.dtype
    act_bytes = jnp.dtype(hidden_states.dtype).itemsize
    cdt_bytes = jnp.dtype(compute_dtype).itemsize
    is_bf16 = jnp.dtype(compute_dtype) == jnp.dtype(jnp.bfloat16)
    h_dtype = compute_dtype if (is_bf16 and cfg["bf16_vpu"]) else jnp.float32

    # ---- row tiling ------------------------------------------------------------------
    tile_rows = cfg["tile_rows"] if tile_rows is None else tile_rows
    tm = min(tile_rows, _round_up(M, 8))
    # Megacore (v7x): keep at least 2 row tiles so both TensorCores get work.
    if cfg["cores"] >= 2 and M > 8:
        tm = min(tm, max(8, _round_up(pl.cdiv(M, 2), 8)))
    # Shrink tm until the VMEM footprint fits comfortably under the physical capacity.
    budget = int(cfg["vmem_cap"] * 0.75)
    while tm > 8 and _vmem_estimate(tm, tf, D, act_bytes, cdt_bytes) > budget:
        tm = max(8, _round_up(tm // 2, 8))

    m_pad = _round_up(M, tm)
    x2d = hidden_states.reshape(M, D)
    if m_pad != M:
        x2d = jnp.pad(x2d, ((0, m_pad - M), (0, 0)))

    # Explicit scoped-VMEM limit: estimate + headroom, never above physical - 8 MiB.
    est = _vmem_estimate(tm, tf, D, act_bytes, cdt_bytes)
    vmem_limit = int(min(cfg["vmem_cap"] - (8 << 20),
                         max(32 << 20, est + (16 << 20))))

    # Optional deeper pipelining of the weight slabs (default: standard double-buffer).
    w_spec_kwargs = {}
    if weight_buffering and weight_buffering != 2:
        w_spec_kwargs["pipeline_mode"] = pl.Buffered(weight_buffering)

    grid = (m_pad // tm, f_pad // tf)  # reduction (d_ff) axis last / innermost
    kernel = functools.partial(_udop_ff_kernel, eps=eps, h_dtype=h_dtype)

    out2d = pl.pallas_call(
        kernel,
        out_shape=jax.ShapeDtypeStruct((m_pad, D), hidden_states.dtype),
        grid_spec=pltpu.PrefetchScalarGridSpec(
            num_scalar_prefetch=0,
            grid=grid,
            in_specs=[
                pl.BlockSpec((tm, D), lambda i, f: (i, 0)),                   # x rows (resident over f)
                pl.BlockSpec((D, tf), lambda i, f: (0, f), **w_spec_kwargs),  # wi^T slab
                pl.BlockSpec((tf, D), lambda i, f: (f, 0), **w_spec_kwargs),  # wo^T slab
            ],
            out_specs=pl.BlockSpec((tm, D), lambda i, f: (i, 0)),
            scratch_shapes=[
                pltpu.VMEM((tm, D), compute_dtype),   # normalized rows (reused across f)
                pltpu.VMEM((tm, D), jnp.float32),     # fp32 accumulator
            ],
        ),
        compiler_params=pltpu.CompilerParams(
            dimension_semantics=("parallel", "arbitrary"),
            vmem_limit_bytes=vmem_limit),
    )(x2d, wi_t, wo_t)

    return out2d[:M].reshape(B, S, D)


def udop_layer_ff(hidden_states, ln_weight, wi, wo, *, eps=1e-6,
                  compute_dtype=jnp.bfloat16, tile_ff=1024, tile_rows=None):
    """Convenience wrapper (prepare + apply). For repeated calls, prepare the weights once
    with prepare_udop_ff_weights() and call udop_layer_ff_apply() directly."""
    wi_t, wo_t, tf = prepare_udop_ff_weights(
        ln_weight, wi, wo, compute_dtype=compute_dtype, tile_ff=tile_ff)
    return udop_layer_ff_apply(hidden_states, wi_t, wo_t, tf=tf, eps=eps,
                               tile_rows=tile_rows)


def _reference(hidden_states, ln_weight, wi, wo, eps=1e-6):
    xf = hidden_states.astype(jnp.float32)
    var = jnp.mean(xf * xf, axis=-1, keepdims=True)
    normed = ln_weight * (xf * jax.lax.rsqrt(var + eps))
    h = jnp.maximum(normed @ wi.T, 0.0)
    y = h @ wo.T
    return hidden_states + y


if __name__ == "__main__":
    # small, module-consistent shapes: batch=2, seq=8, d_model=32, d_ff=64
    B, S, D, F = 2, 8, 32, 64
    key = jax.random.PRNGKey(0)
    k1, k2, k3, k4 = jax.random.split(key, 4)

    hidden_states = jax.random.normal(k1, (B, S, D), dtype=jnp.float32)
    ln_weight = jnp.ones((D,), dtype=jnp.float32) + 0.01 * jax.random.normal(k2, (D,), dtype=jnp.float32)
    wi = 0.05 * jax.random.normal(k3, (F, D), dtype=jnp.float32)  # nn.Linear(d_model, d_ff).weight
    wo = 0.05 * jax.random.normal(k4, (D, F), dtype=jnp.float32)  # nn.Linear(d_ff, d_model).weight

    ref = _reference(hidden_states, ln_weight, wi, wo, eps=1e-6)

    # fp32 compute path: tight tolerance check of the kernel structure.
    out_f32 = jax.block_until_ready(
        udop_layer_ff(hidden_states, ln_weight, wi, wo, eps=1e-6,
                      compute_dtype=jnp.float32))
    assert out_f32.shape == (B, S, D)
    assert jnp.allclose(out_f32, ref, atol=1e-5, rtol=1e-5), "fp32 path mismatch vs reference"

    # bf16 fast path: weights prepared ONCE (hoisted out of the forward), then applied.
    wi_t_bf16, wo_t_bf16, tf_bf16 = prepare_udop_ff_weights(
        ln_weight, wi, wo, compute_dtype=jnp.bfloat16, tile_ff=1024)
    ff_apply = jax.jit(functools.partial(udop_layer_ff_apply, tf=tf_bf16, eps=1e-6))
    out_bf16 = jax.block_until_ready(ff_apply(hidden_states, wi_t_bf16, wo_t_bf16))
    assert out_bf16.shape == (B, S, D)
    assert jnp.allclose(out_bf16, ref, atol=2e-2, rtol=2e-2), "bf16 path mismatch vs reference"

    # Ragged row count exercises the padding (cdiv) path and the >=2 row-tile cap.
    hs2 = hidden_states[:, :7, :]
    ref2 = _reference(hs2, ln_weight, wi, wo, eps=1e-6)
    out2 = jax.block_until_ready(
        udop_layer_ff(hs2, ln_weight, wi, wo, eps=1e-6, compute_dtype=jnp.float32))
    assert out2.shape == (2, 7, D)
    assert jnp.allclose(out2, ref2, atol=1e-5, rtol=1e-5), "padded path mismatch vs reference"

    print("KERNEL_OK")
</pallas_src>

<mosaic_0001>
module attributes {stable_mosaic.version = 11 : i64} {
  func.func @_udop_ff_kernel(%arg0: i32, %arg1: i32, %arg2: memref<16x32xf32, #tpu.memory_space<vmem>>, %arg3: memref<32x64xf32, #tpu.memory_space<vmem>>, %arg4: memref<64x32xf32, #tpu.memory_space<vmem>>, %arg5: memref<16x32xf32, #tpu.memory_space<vmem>>, %arg6: memref<16x32xf32, #tpu.memory_space<vmem>>, %arg7: memref<16x32xf32, #tpu.memory_space<vmem>>) attributes {dimension_semantics = [#tpu.dimension_semantics<parallel>, #tpu.dimension_semantics<arbitrary>], iteration_bounds = array<i64: 1, 1>, scalar_prefetch = 0 : i64, scratch_operands = 2 : i64, tpu.core_type = #tpu.core_type<tc>, window_params = [{transform_indices = @transform_0, window_bounds = array<i64: 16, 32>}, {transform_indices = @transform_1, window_bounds = array<i64: 32, 64>}, {transform_indices = @transform_2, window_bounds = array<i64: 64, 32>}, {transform_indices = @transform_3, window_bounds = array<i64: 16, 32>}]} {
    %c0_i32 = arith.constant 0 : i32
    %0 = arith.cmpi eq, %arg1, %c0_i32 : i32
    %1 = arith.extui %0 : i1 to i32
    %c0_i32_0 = arith.constant 0 : i32
    %2 = arith.cmpi ne, %1, %c0_i32_0 : i32
    scf.if %2 {
      %c0_14 = arith.constant 0 : index
      %c0_15 = arith.constant 0 : index
      %16 = vector.load %arg2[%c0_14, %c0_15] : memref<16x32xf32, #tpu.memory_space<vmem>>, vector<16x32xf32>
      %17 = arith.mulf %16, %16 : vector<16x32xf32>
      %cst_16 = arith.constant dense<0.000000e+00> : vector<16xf32>
      %18 = vector.multi_reduction <add>, %17, %cst_16 [1] : vector<16x32xf32> to vector<16xf32>
      %19 = vector.shape_cast %18 : vector<16xf32> to vector<16x1xf32>
      %cst_17 = arith.constant 3.200000e+01 : f32
      %20 = vector.broadcast %cst_17 : f32 to vector<16x1xf32>
      %21 = arith.divf %19, %20 : vector<16x1xf32>
      %cst_18 = arith.constant 9.99999997E-7 : f32
      %22 = vector.broadcast %cst_18 : f32 to vector<16x1xf32>
      %23 = arith.addf %21, %22 : vector<16x1xf32>
      %24 = math.rsqrt %23 : vector<16x1xf32>
      %25 = vector.broadcast %24 : vector<16x1xf32> to vector<16x32xf32>
      %26 = arith.mulf %16, %25 : vector<16x32xf32>
      %c0_19 = arith.constant 0 : index
      %c0_20 = arith.constant 0 : index
      %27 = vector.load %arg6[%c0_19, %c0_20] : memref<16x32xf32, #tpu.memory_space<vmem>>, vector<16x32xf32>
      tpu.vector_store %arg6[%c0_19, %c0_20], %26 {strides = array<i32>} : memref<16x32xf32, #tpu.memory_space<vmem>>, vector<16x32xf32>,
      %cst_21 = arith.constant 0.000000e+00 : f32
      %28 = vector.broadcast %cst_21 : f32 to vector<16x32xf32>
      %c0_22 = arith.constant 0 : index
      %c0_23 = arith.constant 0 : index
      %29 = vector.load %arg7[%c0_22, %c0_23] : memref<16x32xf32, #tpu.memory_space<vmem>>, vector<16x32xf32>
      tpu.vector_store %arg7[%c0_22, %c0_23], %28 {strides = array<i32>} : memref<16x32xf32, #tpu.memory_space<vmem>>, vector<16x32xf32>,
    } else {
    }
    %c0 = arith.constant 0 : index
    %c0_1 = arith.constant 0 : index
    %3 = vector.load %arg6[%c0, %c0_1] : memref<16x32xf32, #tpu.memory_space<vmem>>, vector<16x32xf32>
    %c0_2 = arith.constant 0 : index
    %c0_3 = arith.constant 0 : index
    %4 = vector.load %arg3[%c0_2, %c0_3] : memref<32x64xf32, #tpu.memory_space<vmem>>, vector<32x64xf32>
    %cst = arith.constant dense<0.000000e+00> : vector<16x64xf32>
    %5 = tpu.matmul %3, %4, %cst {dimension_numbers = #tpu.dot_dimension_numbers<[1], [0], [0], [1], [0, 0, 1, 1], [], []>} : vector<16x32xf32>, vector<32x64xf32>, vector<16x64xf32> -> vector<16x64xf32>
    %cst_4 = arith.constant 0.000000e+00 : f32
    %6 = vector.broadcast %cst_4 : f32 to vector<16x64xf32>
    %7 = arith.maximumf %5, %6 : vector<16x64xf32>
    %c0_5 = arith.constant 0 : index
    %c0_6 = arith.constant 0 : index
    %8 = vector.load %arg7[%c0_5, %c0_6] : memref<16x32xf32, #tpu.memory_space<vmem>>, vector<16x32xf32>
    %c0_7 = arith.constant 0 : index
    %c0_8 = arith.constant 0 : index
    %9 = vector.load %arg4[%c0_7, %c0_8] : memref<64x32xf32, #tpu.memory_space<vmem>>, vector<64x32xf32>
    %cst_9 = arith.constant dense<0.000000e+00> : vector<16x32xf32>
    %10 = tpu.matmul %7, %9, %cst_9 {dimension_numbers = #tpu.dot_dimension_numbers<[1], [0], [0], [1], [0, 0, 1, 1], [], []>} : vector<16x64xf32>, vector<64x32xf32>, vector<16x32xf32> -> vector<16x32xf32>
    %11 = arith.addf %8, %10 : vector<16x32xf32>
    %c0_10 = arith.constant 0 : index
    %c0_11 = arith.constant 0 : index
    %12 = vector.load %arg7[%c0_10, %c0_11] : memref<16x32xf32, #tpu.memory_space<vmem>>, vector<16x32xf32>
    tpu.vector_store %arg7[%c0_10, %c0_11], %11 {strides = array<i32>} : memref<16x32xf32, #tpu.memory_space<vmem>>, vector<16x32xf32>,
    %c0_i32_12 = arith.constant 0 : i32
    %13 = arith.cmpi eq, %arg1, %c0_i32_12 : i32
    %14 = arith.extui %13 : i1 to i32
    %c0_i32_13 = arith.constant 0 : i32
    %15 = arith.cmpi ne, %14, %c0_i32_13 : i32
    scf.if %15 {
      %c0_14 = arith.constant 0 : index
      %c0_15 = arith.constant 0 : index
      %16 = vector.load %arg2[%c0_14, %c0_15] : memref<16x32xf32, #tpu.memory_space<vmem>>, vector<16x32xf32>
      %c0_16 = arith.constant 0 : index
      %c0_17 = arith.constant 0 : index
      %17 = vector.load %arg7[%c0_16, %c0_17] : memref<16x32xf32, #tpu.memory_space<vmem>>, vector<16x32xf32>
      %18 = arith.addf %16, %17 : vector<16x32xf32>
      %c0_18 = arith.constant 0 : index
      %c0_19 = arith.constant 0 : index
      %19 = vector.load %arg5[%c0_18, %c0_19] : memref<16x32xf32, #tpu.memory_space<vmem>>, vector<16x32xf32>
      tpu.vector_store %arg5[%c0_18, %c0_19], %18 {strides = array<i32>} : memref<16x32xf32, #tpu.memory_space<vmem>>, vector<16x32xf32>,
    } else {
    }
    return
  }
  func.func @transform_0(%arg0: i32, %arg1: i32) -> (i32, i32) {
    %c0_i32 = arith.constant 0 : i32
    %c0_i32_0 = arith.constant 0 : i32
    return %arg0, %c0_i32 : i32, i32
  }
  func.func @transform_1(%arg0: i32, %arg1: i32) -> (i32, i32) {
    %c0_i32 = arith.constant 0 : i32
    %c0_i32_0 = arith.constant 0 : i32
    return %c0_i32, %arg1 : i32, i32
  }
  func.func @transform_2(%arg0: i32, %arg1: i32) -> (i32, i32) {
    %c0_i32 = arith.constant 0 : i32
    %c0_i32_0 = arith.constant 0 : i32
    return %arg1, %c0_i32 : i32, i32
  }
  func.func @transform_3(%arg0: i32, %arg1: i32) -> (i32, i32) {
    %c0_i32 = arith.constant 0 : i32
    %c0_i32_0 = arith.constant 0 : i32
    return %arg0, %c0_i32 : i32, i32
  }
}

</mosaic_0001>

<bundles_post_ra>
// kernel: tpu_custom_call.1
= control target key start
LH: loop header
LB: loop body
LE: loop exit
PB: predicated region body
PF: predicated region fallthrough
CT: control target
= control target key end

     0   :  { %vm23_vm0 = vcmask 261120   ;;  %s464_s0 = inlined_call_operand.vmem [shape: f32[16,32], index: 0, kind: input, shape index: {}]   ;;  %s465_s1 = inlined_call_operand.vmem [shape: f32[32,64], index: 1, kind: input, shape index: {}]   ;;  %s466_s2 = inlined_call_operand.vmem [shape: f32[64,32], index: 2, kind: input, shape index: {}]   ;;  %s467_s3 = inlined_call_operand.hbm [shape: f32[16,32], index: 3, kind: output, shape index: {}]  }
   0x1   :  { %v389_v0 = vld [vmem:[%s464_s0] sm:$0xff]  ;;  %v394_v1 = vld [vmem:[%s464_s0 + $0x8] sm:$0xff] }
   0x2   :  { %8 = vsyncpa [#allocation5], 0  ;;  %v21_v2 = vmul.f32 %v389_v0, %v389_v0  ;;  %v22_v3 = vmul.f32 %v394_v1, %v394_v1  ;;  %v45_v6 = vld [vmem:[%s465_s1] sm:$0xff]  ;;  %v46_v7 = vld [vmem:[%s465_s1 + $0x8] sm:$0xff]  ;;  %v362_v36 = vmov 0.0   ;;  %vm143_vm1 = vcmask 523264  }
   0x3   :  { %v306_v8 = vpack.c.bf16 %v46_v7, %v45_v6  ;;  %v47_v9 = vld [vmem:[%s465_s1 + $0x10] sm:$0xff]  ;;  %v48_v10 = vld [vmem:[%s465_s1 + $0x18] sm:$0xff]  ;;  %v135_v12 = vld [vmem:[%s466_s2] sm:$0xff]  ;;  %42 = vst.msk [vmem:[#allocation3 + $0x8] sm:$0xff] %vm23_vm0, %v362_v36 }
   0x4   :  { %v24_v4 = vsel %vm23_vm0, %v21_v2, 0.0  ;;  %v27_v5 = vsel %vm23_vm0, %v22_v3, 0.0  ;;  %v310_v11 = vpack.c.bf16 %v48_v10, %v47_v9  ;;  %v136_v13 = vld [vmem:[%s466_s2 + $0x8] sm:$0xff]  ;;  %v137_v14 = vld [vmem:[%s466_s2 + $0x10] sm:$0xff]  ;;  %v138_v16 = vld [vmem:[%s466_s2 + $0x18] sm:$0xff]  ;;  %41 = vst.msk [vmem:[#allocation3] sm:$0xff] %vm23_vm0, %v362_v36 }
   0x5   :  { %25 = vadd.xlane.f32.xlu0 %v24_v4  ;;  %307 = vmatprep.subr.bf16.mxu0 %v306_v8  ;;  %v314_v15 = vpack.c.bf16 %v136_v13, %v135_v12  ;;  %v318_v17 = vpack.c.bf16 %v138_v16, %v137_v14  ;;  %v139_v18 = vld [vmem:[%s466_s2 + $0x20] sm:$0xff]  ;;  %v140_v19 = vld [vmem:[%s466_s2 + $0x28] sm:$0xff]  ;;  %v141_v33 = vld [vmem:[%s466_s2 + $0x30] sm:$0xff] }
   0x6   :  { %309 = vmatpush3.bf16.msra.mxu0 %v306_v8  ;;  %v322_v20 = vpack.c.bf16 %v140_v19, %v139_v18  ;;  %v142_v34 = vld [vmem:[%s466_s2 + $0x38] sm:$0xff]  ;;  %s363_s2 = smov [#allocation4]  }
   0x7   :  { %311 = vmatprep.subr.bf16.mxu0 %v310_v11  ;;  %315 = vmatprep.subr.bf16.mxu1 %v314_v15  ;;  %v326_v35 = vpack.c.bf16 %v142_v34, %v141_v33  ;;  %s245_s11 = sshll.u32 %s363_s2, 4  ;;  %s246_s11 = int_to_ptr.vmem [resolvable:$true] %s245_s11 }
   0x8   :  { %317 = vmatpush3.bf16.msra.mxu1 %v314_v15  ;;  %s338_s12 = scalar_lea.vmem %s246_s11, 256  ;;  %p343_p1 = scmp.lt.s32.totalorder %s246_s11, %s246_s11 }
   0x9   :  { %28 = vadd.xlane.f32.xlu0 %v27_v5  ;;  %319 = vmatprep.subr.bf16.mxu1 %v318_v17  ;;  %p339_p0 = scmp.ne.s32.totalorder %s246_s11, %s338_s12  ;;  %p344_p2 = scmp.lt.s32.totalorder %s338_s12, %s338_s12 }
   0xa   :  { %313 = vmatpush3.bf16.msra.mxu0 %v310_v11  ;;  %v134_v41 = vld [vmem:[#allocation3 + $0x8] sm:$0xff] }
   0xb   :  { %v133_v42 = vld [vmem:[#allocation3] sm:$0xff]  ;;  %p345_p3 = por %p344_p2, %p343_p1 }
   0xc   :  { %321 = vmatpush3.bf16.msra.mxu1 %v318_v17 }
   0xd   :  { %323 = vmatprep.subr.bf16.mxu1 %v322_v20  ;;  %p346_p4 = pnand %p345_p3, %p339_p0 }
  0x10   :  { %325 = vmatpush3.bf16.msra.mxu1 %v322_v20 }
  0x11   :  { %327 = vmatprep.subr.bf16.mxu1 %v326_v35 }
  0x14   :  { %329 = vmatpush3.bf16.msra.mxu1 %v326_v35 }
  0x92   :  { %v26_v21 = vpop.xlane.xlu0 %25 }
  0x93   :  { %v31_v22 = vmul.f32 0.03125, %v26_v21 }
  0x95   :  { %v33_v23 = vadd.f32 1e-06, %v31_v22 }
  0x96   :  { %v29_v24 = vpop.xlane.xlu0 %28 }
  0x97   :  { %334 = vrsqrt.f32 %v33_v23  ;;  %v32_v25 = vmul.f32 0.03125, %v29_v24 }
  0x99   :  { %v34_v26 = vadd.f32 1e-06, %v32_v25 }
  0x9b   :  { %336 = vrsqrt.f32 %v34_v26 }
  0xa1   :  { %v335_v27 = vpop.eup %334 }
  0xa2   :  { %v37_v28 = vmul.f32 %v335_v27, %v389_v0 }
  0xa4   :  { %39 = vst.msk [vmem:[#allocation2] sm:$0xff] %vm23_vm0, %v37_v28 }
  0xa5   :  { %v337_v29 = vpop.eup %336 }
  0xa6   :  { %v38_v30 = vmul.f32 %v337_v29, %v394_v1 }
  0xa8   :  { %40 = vst.msk [vmem:[#allocation2 + $0x8] sm:$0xff] %vm23_vm0, %v38_v30 }
  0xab   :  { %v43_v31 = vld [vmem:[#allocation2] sm:$0xff] }
  0xac   :  { %284 = vmatprep.mubr.msk.f32.mxu0 %vm23_vm0, %v43_v31 }
  0xaf   :  { %v44_v32 = vld [vmem:[#allocation2 + $0x8] sm:$0xff] }
  0xb0   :  { %285 = vmatmul.mubr.msk.f32.vlgmr.msra.gmra.mrb[0].mxu0 %vm23_vm0, %v44_v32 }
 0x183   :  { %v286_v37 = vpop.f32.mrb[0].mxu0 }
 0x184   :  { %v122_v38 = vpop.f32.mrb[1].mxu0  ;;  %v132_v40 = vmax.f32 %v286_v37, 0.0 }
 0x185   :  { %v131_v39 = vmax.f32 %v122_v38, 0.0 }
 0x187   :  { %303 = vmatprep.mubr.msk.f32.mxu1 %vm143_vm1, %v131_v39 }
 0x188   :  { %304 = vmatmul.mubr.msk.f32.vlgmr.msra.gmra.mrb[0].mxu1 %vm143_vm1, %v132_v40 }
 0x25b   :  { %v305_v43 = vpop.f32.mrb[0].mxu1 }
 0x25c   :  { %v226_v44 = vadd.f32 %v305_v43, %v134_v41  ;;  %v216_v45 = vpop.f32.mrb[1].mxu1 }
 0x25d   :  { %v225_v46 = vadd.f32 %v216_v45, %v133_v42 }
 0x25e   :  { %228 = vst.msk [vmem:[#allocation3 + $0x8] sm:$0xff] %vm23_vm0, %v226_v44 }
 0x25f   :  { %227 = vst.msk [vmem:[#allocation3] sm:$0xff] %vm23_vm0, %v225_v46 }
 0x265   :  { %v235_v47 = vld [vmem:[#allocation3 + $0x8] sm:$0xff] }
 0x266   :  { %v234_v48 = vld [vmem:[#allocation3] sm:$0xff]  ;;  %v237_v49 = vadd.f32 %v235_v47, %v394_v1 }
 0x267   :  { %v236_v50 = vadd.f32 %v234_v48, %v389_v0 }
 0x268   :  { %239 = vst.msk [vmem:[#allocation4 + $0x8] sm:$0xff] %vm23_vm0, %v237_v49 }
 0x269   :  { %238 = vst.msk [vmem:[#allocation4] sm:$0xff] %vm23_vm0, %v236_v50 }
 0x26a   :  { %349 = shalt.err (!%p346_p4)
}
 0x26b   :  { %s350_s15 = scalar_lea.hbm %s467_s3, 256 }
 0x26c   :  { %p351_p5 = scmp.ne.s32.totalorder %s467_s3, %s350_s15  ;;  %p354_p6 = scmp.lt.u32.totalorder %s350_s15, %s467_s3 }
 0x26e   :  { %p356_p7 = pnand %p354_p6, %p351_p5 }
 0x270   :  { %359 = shalt.err (!%p356_p7)
}
 0x271   :  { %s364_s19 = smov 128   ;;  %s365_s20 = smov 8  }
 0x272   :  { %251 = dma.vmem_to_hbm [thread:$0]  %s246_s11, 256, %s467_s3, [#allocation5], %s364_s19, %s364_s19, %s365_s20  }
 0x273   :  { %360 = dma.done.wait [#allocation5], 256  }
 0x274   :  { %361 = vsyncadd [#allocation5], 4294967040 }
 0x275   :  { %255 = vsyncpa [#allocation5], 1 }

</bundles_post_ra>
